<compile_context>
chip_gen: v7x
topology: tpu7x:2x2x1
jax: 0.10.0
libtpu: 0.0.40
codegen_flags: <defaults>
</compile_context>

<pallas_src>
import functools

import jax
import jax.numpy as jnp
from jax.experimental import pallas as pl
from jax.experimental.pallas import tpu as pltpu


def _round_up(v, m):
    return ((v + m - 1) // m) * m


def _is_v5e():
    try:
        kind = jax.devices()[0].device_kind.lower()
    except Exception:
        return False
    return ("v5 lite" in kind) or ("v5e" in kind) or ("v5litepod" in kind)


def _fused_sage_kernel(a_ref, x0_ref, inv_ref, wl_ref, wr_ref, b_ref, o_ref,
                       act_ref, copy_sem, *, num_layers, out_channels, tm,
                       adj_resident):
    l = pl.program_id(0)          # layer index (outer, sequential)
    i = pl.program_id(1)          # row-tile index (inner)
    row0 = pl.multiple_of(i * tm, tm)
    rows = pl.ds(row0, tm)

    # One-time: bring the padded input features from HBM into activation slot 0.
    @pl.when(jnp.logical_and(l == 0, i == 0))
    def _():
        cp = pltpu.make_async_copy(x0_ref, act_ref.at[0], copy_sem)
        cp.start()
        cp.wait()

    prev = l % 2                  # slot holding this layer's input activations
    nxt = (l + 1) % 2             # slot this layer writes (if not last)

    x_prev_full = act_ref[prev]                 # (Np, P) bf16 slab (neighbour features)
    x_prev_rows = act_ref[prev, rows, :]        # (tm, P) bf16 root features for this tile

    if adj_resident:
        a_tile = a_ref[rows, :]                 # adjacency resident in VMEM, slice rows
    else:
        a_tile = a_ref[...]                     # streamed (TM, Np) tile (re-read per layer)

    # Mean aggregation: int8 edge counts -> bf16 MXU matmul with f32 accumulation,
    # then exact f32 inverse-degree row scaling (more accurate than bf16 1/deg).
    agg = jnp.dot(a_tile.astype(jnp.bfloat16), x_prev_full,
                  preferred_element_type=jnp.float32)
    agg = agg * inv_ref[rows, :]                # (tm, 1) f32 broadcast

    # SAGEConv: lin_l(mean_agg) + lin_r(root) + bias   (bf16 MXU, f32 accumulation)
    h = (jnp.dot(agg.astype(jnp.bfloat16), wl_ref[...],
                 preferred_element_type=jnp.float32)
         + jnp.dot(x_prev_rows, wr_ref[...],
                   preferred_element_type=jnp.float32)
         + b_ref[...])

    is_last = l == (num_layers - 1)

    # Hidden layers: ReLU (dropout = identity in eval mode), keep resident in VMEM.
    @pl.when(jnp.logical_not(is_last))
    def _():
        act_ref[nxt, rows, :] = jnp.maximum(h, 0.0).astype(jnp.bfloat16)

    # Final layer only: masked log_softmax over the valid output columns + HBM store.
    @pl.when(is_last)
    def _():
        col = jax.lax.broadcasted_iota(jnp.int32, h.shape, 1)
        masked = jnp.where(col < out_channels, h, -1e30)
        m = jnp.max(masked, axis=-1, keepdims=True)
        s = masked - m
        lse = jnp.log(jnp.sum(jnp.exp(s), axis=-1, keepdims=True))
        o_ref[...] = s - lse


def sage_forward(x, adj_counts, inv_deg, params):
    """Full SAGE forward as a single fused Pallas kernel.

    x          : (N, F_in) float32 node features
    adj_counts : (N, N) int8 dense edge-count matrix (adj_counts[dst, src] = multiplicity)
    inv_deg    : (N, 1) float32 inverse in-degree (0 for isolated nodes)
    params     : list of (W_l (F_in,F_out), W_r (F_in,F_out), b (1,F_out))
    returns    : (N, out_channels) float32 log-probabilities
    """
    n, f_in = x.shape
    num_layers = len(params)
    out_channels = params[-1][0].shape[1]

    dims = [f_in] + [p[0].shape[1] for p in params]
    P = _round_up(max(dims), 128)          # common padded feature width (lane-dense)

    Np = _round_up(n, 128)
    TM = 128 if (_is_v5e() or (Np % 256 != 0)) else 256
    T = Np // TM

    # Adjacency residency: if the padded int8 adjacency fits the budget, keep it fully
    # VMEM-resident (fetched once); otherwise stream row tiles (re-read num_layers times).
    adj_resident = (Np * Np) <= (8 << 20)

    # --- pad + cast inputs ---
    xp = jnp.zeros((Np, P), jnp.bfloat16).at[:n, :f_in].set(x.astype(jnp.bfloat16))
    ap = jnp.zeros((Np, Np), jnp.int8).at[:n, :n].set(adj_counts.astype(jnp.int8))
    invp = jnp.zeros((Np, 1), jnp.float32).at[:n, :].set(inv_deg.astype(jnp.float32))

    wl_s = jnp.zeros((num_layers, P, P), jnp.bfloat16)
    wr_s = jnp.zeros((num_layers, P, P), jnp.bfloat16)
    b_s = jnp.zeros((num_layers, 1, P), jnp.float32)
    for li, (wl, wr, b) in enumerate(params):
        fi, fo = wl.shape
        wl_s = wl_s.at[li, :fi, :fo].set(wl.astype(jnp.bfloat16))
        wr_s = wr_s.at[li, :fi, :fo].set(wr.astype(jnp.bfloat16))
        b_s = b_s.at[li, :, :fo].set(b.astype(jnp.float32))

    if adj_resident:
        adj_spec = pl.BlockSpec((Np, Np), lambda l, i: (0, 0))      # constant index -> 1 DMA
        adj_vmem = 2 * Np * Np
    else:
        adj_spec = pl.BlockSpec((TM, Np), lambda l, i: (i, 0))      # streamed, L re-reads
        adj_vmem = 2 * TM * Np

    # Explicit VMEM budget (double-buffered inputs/outputs + scratch) with margin.
    footprint = (2 * Np * P * 2                    # activation ping-pong scratch (bf16)
                 + adj_vmem                        # adjacency buffers (int8)
                 + 2 * (2 * P * P * 2 + P * 4)     # W_l, W_r, bias blocks (double-buffered)
                 + 2 * TM * P * 4                  # output tile buffers (f32)
                 + 2 * Np * 4)                     # inv_deg (f32)
    vmem_limit = min(max(int(1.4 * footprint) + (4 << 20), 32 << 20), 56 << 20)

    kernel = functools.partial(
        _fused_sage_kernel,
        num_layers=num_layers, out_channels=out_channels, tm=TM,
        adj_resident=adj_resident)

    out_padded = pl.pallas_call(
        kernel,
        out_shape=jax.ShapeDtypeStruct((Np, P), jnp.float32),
        grid_spec=pltpu.PrefetchScalarGridSpec(
            num_scalar_prefetch=0,
            grid=(num_layers, T),
            in_specs=[
                adj_spec,                                            # int8 adjacency
                pl.BlockSpec(memory_space=pl.ANY),                   # x0 stays in HBM (manual DMA)
                pl.BlockSpec((Np, 1), lambda l, i: (0, 0)),          # inv_deg resident (f32)
                pl.BlockSpec((None, P, P), lambda l, i: (l, 0, 0)),  # W_l stack
                pl.BlockSpec((None, P, P), lambda l, i: (l, 0, 0)),  # W_r stack
                pl.BlockSpec((None, 1, P), lambda l, i: (l, 0, 0)),  # bias stack
            ],
            out_specs=pl.BlockSpec((TM, P), lambda l, i: (i, 0)),
            scratch_shapes=[
                pltpu.VMEM((2, Np, P), jnp.bfloat16),   # activation ping-pong slots
                pltpu.SemaphoreType.DMA,                # x0 bootstrap copy
            ],
        ),
        compiler_params=pltpu.CompilerParams(
            dimension_semantics=("arbitrary", "arbitrary"),
            vmem_limit_bytes=vmem_limit,
        ),
    )(ap, xp, invp, wl_s, wr_s, b_s)

    return out_padded[:n, :out_channels]


def sage_reference(x, adj_norm, params):
    """Pure-JAX f32 reference with identical semantics (for sanity checking)."""
    h = x
    num_layers = len(params)
    for i, (wl, wr, b) in enumerate(params):
        agg = adj_norm @ h
        h = agg @ wl + h @ wr + b
        if i < num_layers - 1:
            h = jnp.maximum(h, 0.0)
    return jax.nn.log_softmax(h, axis=-1)


def build_graph(edge_index, num_nodes):
    """Dense edge-count adjacency (int8), f32 inverse degree, and f32 normalized adjacency
    (reference).  PyG convention: messages flow src -> dst, mean over incoming edges."""
    src, dst = edge_index[0], edge_index[1]
    counts = jnp.zeros((num_nodes, num_nodes), jnp.float32).at[dst, src].add(1.0)
    deg = jnp.sum(counts, axis=1, keepdims=True)
    inv_deg = jnp.where(deg > 0, 1.0 / jnp.maximum(deg, 1.0), 0.0)
    return counts.astype(jnp.int8), inv_deg, counts * inv_deg


def init_params(key, in_channels, hidden_channels, out_channels, num_layers):
    dims = [in_channels] + [hidden_channels] * (num_layers - 1) + [out_channels]
    params = []
    for i in range(num_layers):
        f_in, f_out = dims[i], dims[i + 1]
        key, k1, k2 = jax.random.split(key, 3)
        scale = 1.0 / jnp.sqrt(jnp.float32(f_in))
        w_l = jax.random.uniform(k1, (f_in, f_out), jnp.float32, -scale, scale)
        w_r = jax.random.uniform(k2, (f_in, f_out), jnp.float32, -scale, scale)
        b = jnp.zeros((1, f_out), jnp.float32)
        params.append((w_l, w_r, b))
    return params


if __name__ == "__main__":
    key = jax.random.PRNGKey(0)

    num_nodes = 128
    in_channels = 32
    hidden_channels = 64
    out_channels = 16
    num_layers = 3
    num_edges = 512

    key, kx, ke_src, ke_dst, kp = jax.random.split(key, 5)
    x = jax.random.normal(kx, (num_nodes, in_channels), jnp.float32)
    src = jax.random.randint(ke_src, (num_edges,), 0, num_nodes)
    dst = jax.random.randint(ke_dst, (num_edges,), 0, num_nodes)
    edge_index = jnp.stack([src, dst], axis=0)          # (2, E), PyG convention

    adj_counts, inv_deg, adj_norm = build_graph(edge_index, num_nodes)
    params = init_params(kp, in_channels, hidden_channels, out_channels, num_layers)

    out = jax.jit(sage_forward)(x, adj_counts, inv_deg, params)
    out = jax.block_until_ready(out)

    assert out.shape == (num_nodes, out_channels)
    # log_softmax rows should sum (in prob space) to ~1
    assert jnp.allclose(jnp.sum(jnp.exp(out), axis=-1), 1.0, atol=1e-4)
    # loose check vs f32 reference (kernel uses bf16 operands with f32 accumulation)
    ref = sage_reference(x, adj_norm, params)
    assert jnp.max(jnp.abs(out - ref)) < 0.1
    print("KERNEL_OK")
</pallas_src>

<mosaic_0001>
module attributes {stable_mosaic.version = 11 : i64} {
  func.func @_fused_sage_kernel(%arg0: i32, %arg1: i32, %arg2: memref<128x128xi8, #tpu.memory_space<vmem>>, %arg3: memref<128x128xbf16, #tpu.memory_space<any>>, %arg4: memref<128x1xf32, #tpu.memory_space<vmem>>, %arg5: memref<1x128x128xbf16, #tpu.memory_space<vmem>>, %arg6: memref<1x128x128xbf16, #tpu.memory_space<vmem>>, %arg7: memref<1x1x128xf32, #tpu.memory_space<vmem>>, %arg8: memref<128x128xf32, #tpu.memory_space<vmem>>, %arg9: memref<2x128x128xbf16, #tpu.memory_space<vmem>>, %arg10: memref<!tpu.dma_semaphore, #tpu.memory_space<semaphore_mem>>) attributes {dimension_semantics = [#tpu.dimension_semantics<arbitrary>, #tpu.dimension_semantics<arbitrary>], iteration_bounds = array<i64: 3, 1>, scalar_prefetch = 0 : i64, scratch_operands = 2 : i64, tpu.core_type = #tpu.core_type<tc>, window_params = [{pipeline_mode = #tpu.pipeline_mode<synchronous>, transform_indices = @transform_0, window_bounds = array<i64: 128, 128>}, {}, {pipeline_mode = #tpu.pipeline_mode<synchronous>, transform_indices = @transform_2, window_bounds = array<i64: 128, 1>}, {transform_indices = @transform_3, window_bounds = array<i64: 1, 128, 128>}, {transform_indices = @transform_4, window_bounds = array<i64: 1, 128, 128>}, {transform_indices = @transform_5, window_bounds = array<i64: 1, 1, 128>}, {transform_indices = @transform_6, window_bounds = array<i64: 128, 128>}]} {
    %c128_i32 = arith.constant 128 : i32
    %0 = arith.muli %arg1, %c128_i32 : i32
    %1 = tpu.assume_multiple %0, 128 : i32
    %c0_i32 = arith.constant 0 : i32
    %2 = arith.cmpi eq, %arg0, %c0_i32 : i32
    %c0_i32_0 = arith.constant 0 : i32
    %3 = arith.cmpi eq, %arg1, %c0_i32_0 : i32
    %4 = arith.andi %2, %3 : i1
    %5 = arith.extui %4 : i1 to i32
    %c0_i32_1 = arith.constant 0 : i32
    %6 = arith.cmpi ne, %5, %c0_i32_1 : i32
    scf.if %6 {
      %c0_i32_31 = arith.constant 0 : i32
      %c0_i32_32 = arith.constant 0 : i32
      %c0_i32_33 = arith.constant 0 : i32
      %61 = tpu.memref_slice %arg9[%c0_i32_31, %c0_i32_32, %c0_i32_33] : memref<2x128x128xbf16, #tpu.memory_space<vmem>> -> memref<1x128x128xbf16, #tpu.memory_space<vmem>>
      %62 = tpu.memref_squeeze %61 : memref<1x128x128xbf16, #tpu.memory_space<vmem>> -> memref<128x128xbf16, #tpu.memory_space<vmem>>
      tpu.enqueue_dma source(%arg3 : memref<128x128xbf16, #tpu.memory_space<any>>) target(%62 : memref<128x128xbf16, #tpu.memory_space<vmem>>) target_semaphore(%arg10 : memref<!tpu.dma_semaphore, #tpu.memory_space<semaphore_mem>>)
      %c0_i32_34 = arith.constant 0 : i32
      %c0_i32_35 = arith.constant 0 : i32
      %c0_i32_36 = arith.constant 0 : i32
      %63 = tpu.memref_slice %arg9[%c0_i32_34, %c0_i32_35, %c0_i32_36] : memref<2x128x128xbf16, #tpu.memory_space<vmem>> -> memref<1x128x128xbf16, #tpu.memory_space<vmem>>
      %64 = tpu.memref_squeeze %63 : memref<1x128x128xbf16, #tpu.memory_space<vmem>> -> memref<128x128xbf16, #tpu.memory_space<vmem>>
      tpu.wait_dma2 semaphore(%arg10 : memref<!tpu.dma_semaphore, #tpu.memory_space<semaphore_mem>>) src(%arg3 : memref<128x128xbf16, #tpu.memory_space<any>>) dst(%64 : memref<128x128xbf16, #tpu.memory_space<vmem>>)
    } else {
    }
    %c2_i32 = arith.constant 2 : i32
    %c0_i32_2 = arith.constant 0 : i32
    %7 = arith.cmpi eq, %c2_i32, %c0_i32_2 : i32
    %c1_i32 = arith.constant 1 : i32
    %8 = arith.select %7, %c1_i32, %c2_i32 : i32
    %9 = arith.remsi %arg0, %8 : i32
    %c0_i32_3 = arith.constant 0 : i32
    %10 = arith.cmpi ne, %9, %c0_i32_3 : i32
    %c0_i32_4 = arith.constant 0 : i32
    %11 = arith.cmpi slt, %9, %c0_i32_4 : i32
    %c0_i32_5 = arith.constant 0 : i32
    %12 = arith.cmpi slt, %8, %c0_i32_5 : i32
    %13 = arith.xori %11, %12 : i1
    %14 = arith.andi %13, %10 : i1
    %15 = arith.addi %9, %8 : i32
    %16 = arith.select %14, %15, %9 : i32
    %c1_i32_6 = arith.constant 1 : i32
    %17 = arith.addi %arg0, %c1_i32_6 : i32
    %c2_i32_7 = arith.constant 2 : i32
    %c0_i32_8 = arith.constant 0 : i32
    %18 = arith.cmpi eq, %c2_i32_7, %c0_i32_8 : i32
    %c1_i32_9 = arith.constant 1 : i32
    %19 = arith.select %18, %c1_i32_9, %c2_i32_7 : i32
    %20 = arith.remsi %17, %19 : i32
    %c0_i32_10 = arith.constant 0 : i32
    %21 = arith.cmpi ne, %20, %c0_i32_10 : i32
    %c0_i32_11 = arith.constant 0 : i32
    %22 = arith.cmpi slt, %20, %c0_i32_11 : i32
    %c0_i32_12 = arith.constant 0 : i32
    %23 = arith.cmpi slt, %19, %c0_i32_12 : i32
    %24 = arith.xori %22, %23 : i1
    %25 = arith.andi %24, %21 : i1
    %26 = arith.addi %20, %19 : i32
    %27 = arith.select %25, %26, %20 : i32
    %28 = arith.index_cast %16 : i32 to index
    %c0 = arith.constant 0 : index
    %c0_13 = arith.constant 0 : index
    %29 = vector.load %arg9[%28, %c0, %c0_13] : memref<2x128x128xbf16, #tpu.memory_space<vmem>>, vector<1x128x128xbf16>
    %30 = vector.shape_cast %29 : vector<1x128x128xbf16> to vector<128x128xbf16>
    %31 = arith.index_cast %16 : i32 to index
    %32 = arith.index_cast %1 : i32 to index
    %c0_14 = arith.constant 0 : index
    %33 = vector.load %arg9[%31, %32, %c0_14] : memref<2x128x128xbf16, #tpu.memory_space<vmem>>, vector<1x128x128xbf16>
    %34 = vector.shape_cast %33 : vector<1x128x128xbf16> to vector<128x128xbf16>
    %35 = arith.index_cast %1 : i32 to index
    %c0_15 = arith.constant 0 : index
    %36 = vector.load %arg2[%35, %c0_15] : memref<128x128xi8, #tpu.memory_space<vmem>>, vector<128x128xi8>
    %37 = arith.sitofp %36 : vector<128x128xi8> to vector<128x128xbf16>
    %cst = arith.constant dense<0.000000e+00> : vector<128x128xf32>
    %38 = tpu.matmul %37, %30, %cst {dimension_numbers = #tpu.dot_dimension_numbers<[1], [0], [0], [1], [0, 0, 1, 1], [], []>} : vector<128x128xbf16>, vector<128x128xbf16>, vector<128x128xf32> -> vector<128x128xf32>
    %39 = arith.index_cast %1 : i32 to index
    %c0_16 = arith.constant 0 : index
    %40 = vector.load %arg4[%39, %c0_16] : memref<128x1xf32, #tpu.memory_space<vmem>>, vector<128x1xf32>
    %41 = vector.broadcast %40 : vector<128x1xf32> to vector<128x128xf32>
    %42 = arith.mulf %38, %41 : vector<128x128xf32>
    %43 = arith.truncf %42 : vector<128x128xf32> to vector<128x128xbf16>
    %c0_17 = arith.constant 0 : index
    %c0_18 = arith.constant 0 : index
    %c0_19 = arith.constant 0 : index
    %44 = vector.load %arg5[%c0_17, %c0_18, %c0_19] : memref<1x128x128xbf16, #tpu.memory_space<vmem>>, vector<1x128x128xbf16>
    %45 = vector.shape_cast %44 : vector<1x128x128xbf16> to vector<128x128xbf16>
    %cst_20 = arith.constant dense<0.000000e+00> : vector<128x128xf32>
    %46 = tpu.matmul %43, %45, %cst_20 {dimension_numbers = #tpu.dot_dimension_numbers<[1], [0], [0], [1], [0, 0, 1, 1], [], []>} : vector<128x128xbf16>, vector<128x128xbf16>, vector<128x128xf32> -> vector<128x128xf32>
    %c0_21 = arith.constant 0 : index
    %c0_22 = arith.constant 0 : index
    %c0_23 = arith.constant 0 : index
    %47 = vector.load %arg6[%c0_21, %c0_22, %c0_23] : memref<1x128x128xbf16, #tpu.memory_space<vmem>>, vector<1x128x128xbf16>
    %48 = vector.shape_cast %47 : vector<1x128x128xbf16> to vector<128x128xbf16>
    %cst_24 = arith.constant dense<0.000000e+00> : vector<128x128xf32>
    %49 = tpu.matmul %34, %48, %cst_24 {dimension_numbers = #tpu.dot_dimension_numbers<[1], [0], [0], [1], [0, 0, 1, 1], [], []>} : vector<128x128xbf16>, vector<128x128xbf16>, vector<128x128xf32> -> vector<128x128xf32>
    %50 = arith.addf %46, %49 : vector<128x128xf32>
    %c0_25 = arith.constant 0 : index
    %c0_26 = arith.constant 0 : index
    %c0_27 = arith.constant 0 : index
    %51 = vector.load %arg7[%c0_25, %c0_26, %c0_27] : memref<1x1x128xf32, #tpu.memory_space<vmem>>, vector<1x1x128xf32>
    %52 = vector.shape_cast %51 : vector<1x1x128xf32> to vector<1x128xf32>
    %53 = vector.broadcast %52 : vector<1x128xf32> to vector<128x128xf32>
    %54 = arith.addf %50, %53 : vector<128x128xf32>
    %c2_i32_28 = arith.constant 2 : i32
    %55 = arith.cmpi eq, %arg0, %c2_i32_28 : i32
    %true = arith.constant true
    %56 = arith.xori %55, %true : i1
    %57 = arith.extui %56 : i1 to i32
    %c0_i32_29 = arith.constant 0 : i32
    %58 = arith.cmpi ne, %57, %c0_i32_29 : i32
    scf.if %58 {
      %cst_31 = arith.constant 0.000000e+00 : f32
      %61 = vector.broadcast %cst_31 : f32 to vector<128x128xf32>
      %62 = arith.maximumf %54, %61 : vector<128x128xf32>
      %63 = arith.truncf %62 : vector<128x128xf32> to vector<128x128xbf16>
      %64 = arith.index_cast %27 : i32 to index
      %65 = arith.index_cast %1 : i32 to index
      %c0_32 = arith.constant 0 : index
      %66 = vector.load %arg9[%64, %65, %c0_32] : memref<2x128x128xbf16, #tpu.memory_space<vmem>>, vector<1x128x128xbf16>
      %67 = vector.shape_cast %66 : vector<1x128x128xbf16> to vector<128x128xbf16>
      %68 = vector.shape_cast %63 : vector<128x128xbf16> to vector<1x128x128xbf16>
      tpu.vector_store %arg9[%64, %65, %c0_32], %68 {strides = array<i32>} : memref<2x128x128xbf16, #tpu.memory_space<vmem>>, vector<1x128x128xbf16>,
    } else {
    }
    %59 = arith.extui %55 : i1 to i32
    %c0_i32_30 = arith.constant 0 : i32
    %60 = arith.cmpi ne, %59, %c0_i32_30 : i32
    scf.if %60 {
      %61 = tpu.iota {dimensions = array<i32: 1>} : vector<128x128xi32>
      %c16_i32 = arith.constant 16 : i32
      %62 = vector.broadcast %c16_i32 : i32 to vector<128x128xi32>
      %63 = arith.cmpi slt, %61, %62 : vector<128x128xi32>
      %cst_31 = arith.constant -1.000000e+30 : f32
      %64 = vector.broadcast %cst_31 : f32 to vector<128x128xf32>
      %65 = arith.select %63, %54, %64 : vector<128x128xi1>, vector<128x128xf32>
      %cst_32 = arith.constant dense<0xFF800000> : vector<128xf32>
      %66 = vector.multi_reduction <maximumf>, %65, %cst_32 [1] : vector<128x128xf32> to vector<128xf32>
      %67 = vector.shape_cast %66 : vector<128xf32> to vector<128x1xf32>
      %68 = vector.broadcast %67 : vector<128x1xf32> to vector<128x128xf32>
      %69 = arith.subf %65, %68 : vector<128x128xf32>
      %70 = math.exp %69 : vector<128x128xf32>
      %cst_33 = arith.constant dense<0.000000e+00> : vector<128xf32>
      %71 = vector.multi_reduction <add>, %70, %cst_33 [1] : vector<128x128xf32> to vector<128xf32>
      %72 = vector.shape_cast %71 : vector<128xf32> to vector<128x1xf32>
      %73 = math.log %72 : vector<128x1xf32>
      %74 = vector.broadcast %73 : vector<128x1xf32> to vector<128x128xf32>
      %75 = arith.subf %69, %74 : vector<128x128xf32>
      %c0_34 = arith.constant 0 : index
      %c0_35 = arith.constant 0 : index
      %76 = vector.load %arg8[%c0_34, %c0_35] : memref<128x128xf32, #tpu.memory_space<vmem>>, vector<128x128xf32>
      tpu.vector_store %arg8[%c0_34, %c0_35], %75 {strides = array<i32>} : memref<128x128xf32, #tpu.memory_space<vmem>>, vector<128x128xf32>,
    } else {
    }
    return
  }
  func.func @transform_0(%arg0: i32, %arg1: i32) -> (i32, i32) {
    %c0_i32 = arith.constant 0 : i32
    %c0_i32_0 = arith.constant 0 : i32
    %c0_i32_1 = arith.constant 0 : i32
    return %c0_i32, %c0_i32_0 : i32, i32
  }
  func.func @transform_2(%arg0: i32, %arg1: i32) -> (i32, i32) {
    %c0_i32 = arith.constant 0 : i32
    %c0_i32_0 = arith.constant 0 : i32
    %c0_i32_1 = arith.constant 0 : i32
    return %c0_i32, %c0_i32_0 : i32, i32
  }
  func.func @transform_3(%arg0: i32, %arg1: i32) -> (i32, i32, i32) {
    %c0_i32 = arith.constant 0 : i32
    %c0_i32_0 = arith.constant 0 : i32
    %c0_i32_1 = arith.constant 0 : i32
    return %arg0, %c0_i32, %c0_i32_0 : i32, i32, i32
  }
  func.func @transform_4(%arg0: i32, %arg1: i32) -> (i32, i32, i32) {
    %c0_i32 = arith.constant 0 : i32
    %c0_i32_0 = arith.constant 0 : i32
    %c0_i32_1 = arith.constant 0 : i32
    return %arg0, %c0_i32, %c0_i32_0 : i32, i32, i32
  }
  func.func @transform_5(%arg0: i32, %arg1: i32) -> (i32, i32, i32) {
    %c0_i32 = arith.constant 0 : i32
    %c0_i32_0 = arith.constant 0 : i32
    %c0_i32_1 = arith.constant 0 : i32
    return %arg0, %c0_i32, %c0_i32_0 : i32, i32, i32
  }
  func.func @transform_6(%arg0: i32, %arg1: i32) -> (i32, i32) {
    %c0_i32 = arith.constant 0 : i32
    %c0_i32_0 = arith.constant 0 : i32
    return %arg1, %c0_i32 : i32, i32
  }
}

</mosaic_0001>

<bundles_post_ra>
// kernel: sage_forward.1
= control target key start
LH: loop header
LB: loop body
LE: loop exit
PB: predicated region body
PF: predicated region fallthrough
CT: control target
= control target key end

     0   :  { %s1714_s21 = smov 0   ;;  %s1716_s22 = smov 0   ;;  %s2132_s0 = inlined_call_operand.vmem [shape: s8[128,128], index: 0, kind: input, shape index: {}]   ;;  %s2133_s1 = inlined_call_operand.vmem [shape: bf16[128,128], index: 1, kind: input, shape index: {}]   ;;  %s2134_s2 = inlined_call_operand.vmem [shape: f32[128,1], index: 2, kind: input, shape index: {}]   ;;  %s2135_s3 = inlined_call_operand.vmem [shape: bf16[3,128,128], index: 3, kind: input, shape index: {}]   ;;  %s2136_s4 = inlined_call_operand.vmem [shape: bf16[3,128,128], index: 4, kind: input, shape index: {}]   ;;  %s2137_s5 = inlined_call_operand.vmem [shape: f32[3,1,128], index: 5, kind: input, shape index: {}]   ;;  %s2138_s6 = inlined_call_operand.vmem [shape: f32[128,128], index: 6, kind: output, shape index: {}]  }
   0x1   :  { %s1718_s23 = smov 0  }
   0x2 LB: > { %s28_s24 = sadd.s32 1, %s1672_s22  ;;  %p1322_p0 = scmp.ge.s32.totalorder %s1676_s23, 1  ;;  %s1676_s23 = sphi %s1718_s23, %s16_s23   ;;  %s1672_s22 = sphi %s1716_s22, %s2140_s22   ;;  %s1668_s21 = sphi %s1714_s21, %s2139_s21  }
   0x3   : > { %p30_p1 = scmp.ge.s32.totalorder %s28_s24, 3  ;;  %p218_p2 = scmp.lt.s32.totalorder %s1676_s23, 4 }
   0x5   : > { %s2142_s24 = smov (%p30_p1, %s28_s24), 0  ;;  %p219_p3 = pnand %p1322_p0, %p218_p2 }
   0x6   : > { %p254_p4 = scmp.lt.s32.totalorder (!%p219_p3), %s1668_s21, 2  ;;  %p275_p5 = scmp.eq.s32.totalorder (!%p219_p3), %s1668_s21, 0 }
   0x7   : > { %222 = sbr.rel (%p219_p3) target bundleno = 889 (0x379), region = 40 }
   0xe   : > { %s1737_s25 = scalar_select %p254_p4, %s1668_s21, 2 }
   0xf   : > { %280 = sbr.rel (!%p275_p5) target bundleno = 25 (0x19), region = 44  ;;  %v313_v0 = vld [vmem:[%s2133_s1] sm:$0xff] (%p275_p5)  ;;  %v315_v1 = vld [vmem:[%s2133_s1 + $0x8] sm:$0xff] (%p275_p5)  ;;  %v317_v2 = vld [vmem:[%s2133_s1 + $0x10] sm:$0xff] (%p275_p5) }
  0x10   : > { %s1363_s26 = sshll.u32 %s1737_s25, 6  ;;  %s266_s29 = scalar_lea.vmem %s2137_s5, %s1737_s25  ;;  %314 = vst [vmem:[#allocation2] sm:$0xff] (%p275_p5), %v313_v0  ;;  %316 = vst [vmem:[#allocation2 + $0x8] sm:$0xff] (%p275_p5), %v315_v1  ;;  %v319_v3 = vld [vmem:[%s2133_s1 + $0x18] sm:$0xff] (%p275_p5)  ;;  %v321_v4 = vld [vmem:[%s2133_s1 + $0x20] sm:$0xff] (%p275_p5) }
  0x11   : > { %s1747_s8 = scalar_lea.vmem %s2135_s3, %s1363_s26  ;;  %s1752_s11 = scalar_lea.vmem %s2136_s4, %s1363_s26  ;;  %318 = vst [vmem:[#allocation2 + $0x10] sm:$0xff] (%p275_p5), %v317_v2  ;;  %v323_v5 = vld [vmem:[%s2133_s1 + $0x28] sm:$0xff] (%p275_p5)  ;;  %320 = vst [vmem:[#allocation2 + $0x18] sm:$0xff] (%p275_p5), %v319_v3  ;;  %v325_v6 = vld [vmem:[%s2133_s1 + $0x30] sm:$0xff] (%p275_p5) }
  0x12   : > { %322 = vst [vmem:[#allocation2 + $0x20] sm:$0xff] (%p275_p5), %v321_v4  ;;  %324 = vst [vmem:[#allocation2 + $0x28] sm:$0xff] (%p275_p5), %v323_v5  ;;  %v327_v7 = vld [vmem:[%s2133_s1 + $0x38] sm:$0xff] (%p275_p5) }
  0x13   : > { %326 = vst [vmem:[#allocation2 + $0x30] sm:$0xff] (%p275_p5), %v325_v6  ;;  %328 = vst [vmem:[#allocation2 + $0x38] sm:$0xff] (%p275_p5), %v327_v7 }
  0x16   : > { %336 = vsyncadd [#allocation3], 1024 }
  0x17   : > { %1664 = dma.done.wait [#allocation3], 1024 }
  0x18   : > { %1665 = vsyncadd [#allocation3], 4294966272 }
  0x19 PF: > { %p341_p6 = scmp.lt.s32.totalorder %s1668_s21, 0  ;;  %s342_s12 = ssub.s32 0, %s1668_s21  ;;  %v1783_v8 = vld [vmem:[%s2132_s0] sm:$0xff]  ;;  %v1678_v10 = vmov 0   ;;  %v506_v11 = vld [vmem:[%s2134_s2 + $0x10] sm:$0xff]  ;;  %v507_v13 = vld [vmem:[%s2134_s2 + $0x18] sm:$0xff] }
  0x1a   : > { %s1328_s15 = smin.u32 %s1668_s21, %s342_s12  ;;  %s1787_s16 = sadd.s32 1, %s1668_s21  ;;  %v398_v9 = vunpack.c.l.s8.bf16 %v1783_v8  ;;  %1571 = vset.pattern.permute.xlu1 %v1678_v10  ;;  %1570 = vset.pattern.permute.xlu0 %v1678_v10  ;;  %v504_v12 = vld [vmem:[%s2134_s2] sm:$0xff]  ;;  %v505_v14 = vld [vmem:[%s2134_s2 + $0x8] sm:$0xff]  ;;  %v515_v19 = vld [vmem:[%s2134_s2 + $0x58] sm:$0xff]  ;;  %v399_v46 = vunpack.c.h.s8.bf16 %v1783_v8 }
  0x1b   : > { %s344_s26 = sand.u32 1, %s1328_s15   ;;  %532 = vperm.xlu1 %1571, %v506_v11   ;;  %522 = vperm.xlu0 %1570, %v504_v12   ;;  %s355_s28 = ssub.s32 0, %s1787_s16  ;;  %v513_v15 = vld [vmem:[%s2134_s2 + $0x48] sm:$0xff]  ;;  %v512_v16 = vld [vmem:[%s2134_s2 + $0x40] sm:$0xff]  ;;  %v514_v20 = vld [vmem:[%s2134_s2 + $0x50] sm:$0xff] }
  0x1c   : > { %s345_s27 = ssub.s32 0, %s344_s26  ;;  %1433 = vmatprep.mubr.bf16.mxu0 %v398_v9  ;;  %p354_p7 = scmp.lt.s32.totalorder %s1787_s16, 0  ;;  %v1572_v17 = vld [vmem:[%s1752_s11] sm:$0xff]   ;;  %v1573_v18 = vld [vmem:[%s1752_s11 + $0x8] sm:$0xff]   ;;  %v1574_v21 = vld [vmem:[%s1752_s11 + $0x10] sm:$0xff]  }
  0x1d   : > { %s2144_s27 = smov (!%p341_p6, %s345_s27), %s344_s26  ;;  %s1331_s12 = smin.u32 %s355_s28, %s1787_s16  ;;  %1449 = vmatprep.subr.bf16.mxu1 %v1572_v17  ;;  %v509_v24 = vld [vmem:[%s2134_s2 + $0x28] sm:$0xff]  ;;  %v508_v25 = vld [vmem:[%s2134_s2 + $0x20] sm:$0xff]  ;;  %v1575_v26 = vld [vmem:[%s1752_s11 + $0x18] sm:$0xff]  }
  0x1e   : > { %p1330_p8 = scmp.lt.s32.totalorder %s2144_s27, 0  ;;  %s351_s13 = sadd.s32 2, %s2144_s27  ;;  %1450 = vmatpush3.bf16.msra.mxu1 %v1572_v17  ;;  %v511_v27 = vld [vmem:[%s2134_s2 + $0x38] sm:$0xff]  ;;  %v510_v29 = vld [vmem:[%s2134_s2 + $0x30] sm:$0xff]  ;;  %v1576_v30 = vld [vmem:[%s1752_s11 + $0x20] sm:$0xff]  }
  0x1f   : > { %537 = vperm.xlu1 %1571, %v507_v13   ;;  %527 = vperm.xlu0 %1570, %v505_v14   ;;  %s357_s19 = sand.u32 1, %s1331_s12   ;;  %v517_v31 = vld [vmem:[%s2134_s2 + $0x68] sm:$0xff]  ;;  %v516_v32 = vld [vmem:[%s2134_s2 + $0x60] sm:$0xff]  ;;  %v519_v36 = vld [vmem:[%s2134_s2 + $0x78] sm:$0xff]  ;;  %p1354_p10 = scmp.eq.s32.totalorder %s1668_s21, 2 }
  0x20   : > { %s2146_s13 = smov (!%p1330_p8, %s351_s13), %s2144_s27  ;;  %s358_s20 = ssub.s32 0, %s357_s19  ;;  %1451 = vmatprep.subr.bf16.mxu1 %v1573_v18  ;;  %v1578_v34 = vld [vmem:[%s1752_s11 + $0x28] sm:$0xff]   ;;  %v518_v37 = vld [vmem:[%s2134_s2 + $0x70] sm:$0xff]  ;;  %v1582_v40 = vld [vmem:[%s1752_s11 + $0x38] sm:$0xff]  }
  0x21   : > { %s2148_s20 = smov (!%p354_p7, %s358_s20), %s357_s19  ;;  %s1366_s30 = sshll.u32 %s2146_s13, 6  ;;  %v1580_v38 = vld [vmem:[%s1752_s11 + $0x30] sm:$0xff]   ;;  %v1577_v43 = vld [vmem:[%s1747_s8] sm:$0xff]   ;;  %v395_v44 = vld [vmem:[%s2132_s0 + $0x8] sm:$0xff] }
  0x22   : > { %p1333_p9 = scmp.lt.s32.totalorder %s2148_s20, 0  ;;  %s364_s27 = sadd.s32 2, %s2148_s20  ;;  %1452 = vmatpush3.bf16.msra.mxu1 %v1573_v18  ;;  %v1579_v45 = vld [vmem:[%s1747_s8 + $0x8] sm:$0xff]   ;;  %v400_v47 = vunpack.c.l.s8.bf16 %v395_v44  ;;  %v1581_v48 = vld [vmem:[%s1747_s8 + $0x10] sm:$0xff]   ;;  %v1583_v50 = vld [vmem:[%s1747_s8 + $0x18] sm:$0xff]   ;;  %v401_v51 = vunpack.c.h.s8.bf16 %v395_v44 }
  0x23   : > { %567 = vperm.xlu1 %1571, %v513_v15   ;;  %562 = vperm.xlu0 %1570, %v512_v16   ;;  %s1826_s16 = scalar_lea.vmem [#allocation2], %s1366_s30  ;;  %v396_v49 = vld [vmem:[%s2132_s0 + $0x10] sm:$0xff]  ;;  %v1584_v53 = vld [vmem:[%s1747_s8 + $0x20] sm:$0xff]   ;;  %v397_v54 = vld [vmem:[%s2132_s0 + $0x18] sm:$0xff] }
  0x24   : > { %s2150_s27 = smov (!%p1333_p9, %s364_s27), %s2148_s20  ;;  %v369_v22 = vld [vmem:[%s1826_s16] sm:$0xff]  ;;  %v370_v23 = vld [vmem:[%s1826_s16 + $0x8] sm:$0xff]  ;;  %1453 = vmatprep.subr.bf16.mxu1 %v1574_v21  ;;  %v371_v28 = vld [vmem:[%s1826_s16 + $0x10] sm:$0xff]  ;;  %v402_v52 = vunpack.c.l.s8.bf16 %v396_v49  ;;  %v403_v56 = vunpack.c.h.s8.bf16 %v396_v49  ;;  %v404_v57 = vunpack.c.l.s8.bf16 %v397_v54  ;;  %v405_v58 = vunpack.c.h.s8.bf16 %v397_v54 }
  0x25   : > { %1417 = vmatprep.subr.bf16.mxu0 %v369_v22  ;;  %1465 = vmatprep.mubr.bf16.mxu1 %v369_v22  ;;  %v372_v33 = vld [vmem:[%s1826_s16 + $0x18] sm:$0xff]  ;;  %v373_v35 = vld [vmem:[%s1826_s16 + $0x20] sm:$0xff]  ;;  %v374_v39 = vld [vmem:[%s1826_s16 + $0x28] sm:$0xff]  ;;  %s1368_s25 = sshll.u32 (!%p1354_p10), %s2150_s27, 6 }
  0x26   : > { %1418 = vmatpush3.bf16.msra.mxu0 %v369_v22  ;;  %1454 = vmatpush3.bf16.msra.mxu1 %v1574_v21  ;;  %v375_v41 = vld [vmem:[%s1826_s16 + $0x30] sm:$0xff]  ;;  %v376_v42 = vld [vmem:[%s1826_s16 + $0x38] sm:$0xff]  ;;  %v1585_v55 = vld [vmem:[%s1747_s8 + $0x28] sm:$0xff]  }
  0x27   : > { %577 = vperm.xlu1 %1571, %v515_v19   ;;  %572 = vperm.xlu0 %1570, %v514_v20   ;;  %v1586_v59 = vld [vmem:[%s1747_s8 + $0x30] sm:$0xff]   ;;  %v1587_v60 = vld [vmem:[%s1747_s8 + $0x38] sm:$0xff]  }
  0x28   : > { %1419 = vmatprep.subr.bf16.mxu0 %v370_v23  ;;  %1455 = vmatprep.subr.bf16.mxu1 %v1575_v26 }
  0x2a   : > { %1420 = vmatpush3.bf16.msra.mxu0 %v370_v23  ;;  %1456 = vmatpush3.bf16.msra.mxu1 %v1575_v26 }
  0x2b   : > { %547 = vperm.xlu1 %1571, %v509_v24   ;;  %542 = vperm.xlu0 %1570, %v508_v25  }
  0x2c   : > { %1421 = vmatprep.subr.bf16.mxu0 %v371_v28  ;;  %1457 = vmatprep.subr.bf16.mxu1 %v1576_v30 }
  0x2e   : > { %1422 = vmatpush3.bf16.msra.mxu0 %v371_v28  ;;  %1458 = vmatpush3.bf16.msra.mxu1 %v1576_v30 }
  0x2f   : > { %557 = vperm.xlu1 %1571, %v511_v27   ;;  %552 = vperm.xlu0 %1570, %v510_v29  }
  0x30   : > { %1423 = vmatprep.subr.bf16.mxu0 %v372_v33  ;;  %1459 = vmatprep.subr.bf16.mxu1 %v1578_v34 }
  0x32   : > { %1424 = vmatpush3.bf16.msra.mxu0 %v372_v33  ;;  %1460 = vmatpush3.bf16.msra.mxu1 %v1578_v34 }
  0x33   : > { %587 = vperm.xlu1 %1571, %v517_v31   ;;  %582 = vperm.xlu0 %1570, %v516_v32  }
  0x34   : > { %1425 = vmatprep.subr.bf16.mxu0 %v373_v35  ;;  %1461 = vmatprep.subr.bf16.mxu1 %v1580_v38 }
  0x36   : > { %1426 = vmatpush3.bf16.msra.mxu0 %v373_v35  ;;  %1462 = vmatpush3.bf16.msra.mxu1 %v1580_v38 }
  0x37   : > { %597 = vperm.xlu1 %1571, %v519_v36   ;;  %592 = vperm.xlu0 %1570, %v518_v37  }
  0x38   : > { %1427 = vmatprep.subr.bf16.mxu0 %v374_v39  ;;  %1463 = vmatprep.subr.bf16.mxu1 %v1582_v40 }
  0x3a   : > { %1428 = vmatpush3.bf16.msra.mxu0 %v374_v39  ;;  %1464 = vmatpush3.bf16.msra.mxu1 %v1582_v40 }
  0x3b   : > { %1429 = vmatprep.subr.bf16.mxu0 %v375_v41  ;;  %1513 = vmatprep.subr.bf16.mxu1 %v1577_v43 }
  0x3d   : > { %1466 = vmatmul.mubr.bf16.vlgmr.msra.gmra.mrb[0].mxu1 %v370_v23 }
  0x3e   : > { %1430 = vmatpush3.bf16.msra.mxu0 %v375_v41  ;;  %1521 = vmatpush3.bf16.msra.mxu1 %v1577_v43 }
  0x3f   : > { %1431 = vmatprep.subr.bf16.mxu0 %v376_v42  ;;  %1469 = vmatprep.mubr.bf16.mxu1 %v371_v28 }
  0x40   : > { %1514 = vmatprep.subr.bf16.mxu1 %v1579_v45 }
  0x42   : > { %1432 = vmatpush3.bf16.msra.mxu0 %v376_v42  ;;  %1522 = vmatpush3.bf16.msra.mxu1 %v1579_v45 }
  0x43   : > { %1481 = vmatprep.subr.bf16.mxu0 %v1577_v43  ;;  %1515 = vmatprep.subr.bf16.mxu1 %v1581_v48 }
  0x45   : > { %1434 = vmatmul.mubr.bf16.vlgmr.msra.gmra.mrb[0].mxu0 %v399_v46  ;;  %1470 = vmatmul.mubr.bf16.gmra.mrb[4].mxu1 %v372_v33 }
  0x46   : > { %1437 = vmatprep.mubr.bf16.mxu0 %v400_v47  ;;  %1482 = vmatpush3.bf16.msra.mxu0 %v1577_v43 }
  0x47   : > { %1483 = vmatprep.subr.bf16.mxu0 %v1579_v45  ;;  %1523 = vmatpush3.bf16.msra.mxu1 %v1581_v48 }
  0x48   : > { %1473 = vmatprep.mubr.bf16.mxu1 %v373_v35  ;;  %1516 = vmatprep.subr.bf16.mxu1 %v1583_v50 }
  0x4a   : > { %1484 = vmatpush3.bf16.msra.mxu0 %v1579_v45 }
  0x4b   : > { %1485 = vmatprep.subr.bf16.mxu0 %v1581_v48  ;;  %1524 = vmatpush3.bf16.msra.mxu1 %v1583_v50 }
  0x4c   : > { %1517 = vmatprep.subr.bf16.mxu1 %v1584_v53 }
  0x4d   : > { %1438 = vmatmul.mubr.bf16.gmra.mrb[4].mxu0 %v401_v51  ;;  %1474 = vmatmul.mubr.bf16.gmra.mrb[8].mxu1 %v374_v39 }
  0x4e   : > { %1441 = vmatprep.mubr.bf16.mxu0 %v402_v52  ;;  %1486 = vmatpush3.bf16.msra.mxu0 %v1581_v48 }
  0x4f   : > { %1487 = vmatprep.subr.bf16.mxu0 %v1583_v50  ;;  %1525 = vmatpush3.bf16.msra.mxu1 %v1584_v53 }
  0x50   : > { %1477 = vmatprep.mubr.bf16.mxu1 %v375_v41  ;;  %1518 = vmatprep.subr.bf16.mxu1 %v1585_v55 }
  0x52   : > { %1488 = vmatpush3.bf16.msra.mxu0 %v1583_v50 }
  0x53   : > { %1489 = vmatprep.subr.bf16.mxu0 %v1584_v53  ;;  %1526 = vmatpush3.bf16.msra.mxu1 %v1585_v55 }
  0x54   : > { %1519 = vmatprep.subr.bf16.mxu1 %v1586_v59 }
  0x55   : > { %1442 = vmatmul.mubr.bf16.gmra.mrb[8].mxu0 %v403_v56  ;;  %1478 = vmatmul.mubr.bf16.gmra.mrb[12].mxu1 %v376_v42 }
  0x56   : > { %1445 = vmatprep.mubr.bf16.mxu0 %v404_v57  ;;  %1490 = vmatpush3.bf16.msra.mxu0 %v1584_v53 }
  0x57   : > { %1491 = vmatprep.subr.bf16.mxu0 %v1585_v55  ;;  %1527 = vmatpush3.bf16.msra.mxu1 %v1586_v59 }
  0x58   : > { %1520 = vmatprep.subr.bf16.mxu1 %v1587_v60 }
  0x5a   : > { %1492 = vmatpush3.bf16.msra.mxu0 %v1585_v55 }
  0x5b   : > { %1493 = vmatprep.subr.bf16.mxu0 %v1586_v59  ;;  %1528 = vmatpush3.bf16.msra.mxu1 %v1587_v60 }
  0x5d   : > { %1446 = vmatmul.mubr.bf16.gmra.mrb[12].mxu0 %v405_v58 }
  0x5e   : > { %1494 = vmatpush3.bf16.msra.mxu0 %v1586_v59 }
  0x5f   : > { %1495 = vmatprep.subr.bf16.mxu0 %v1587_v60 }
  0x62   : > { %1496 = vmatpush3.bf16.msra.mxu0 %v1587_v60 }
  0x9a   : > { %v533_v61 = vpop.permute.xlu1 %532  ;;  %v523_v62 = vpop.permute.xlu0 %522 }
  0x9e   : > { %v538_v63 = vpop.permute.xlu1 %537  ;;  %v528_v0 = vpop.permute.xlu0 %527 }
  0xa2   : > { %v568_v1 = vpop.permute.xlu1 %567  ;;  %v563_v2 = vpop.permute.xlu0 %562 }
  0xa6   : > { %v578_v4 = vpop.permute.xlu1 %577  ;;  %v573_v7 = vpop.permute.xlu0 %572 }
  0xaa   : > { %v548_v11 = vpop.permute.xlu1 %547  ;;  %v543_v17 = vpop.permute.xlu0 %542 }
  0xae   : > { %v558_v26 = vpop.permute.xlu1 %557  ;;  %v553_v28 = vpop.permute.xlu0 %552 }
  0xb2   : > { %v588_v40 = vpop.permute.xlu1 %587  ;;  %v583_v44 = vpop.permute.xlu0 %582 }
  0xb6   : > { %v598_v50 = vpop.permute.xlu1 %597  ;;  %v593_v52 = vpop.permute.xlu0 %592 }
 0x110   : > { %v1883_v3 = vpop.f32.mrb[0].mxu1 }
 0x111   : > { %v1885_v5 = vpop.f32.mrb[1].mxu1 }
 0x112   : > { %v1887_v6 = vpop.f32.mrb[2].mxu1 }
 0x113   : > { %v1889_v8 = vpop.f32.mrb[3].mxu1 }
 0x118   : > { %v1435_v9 = vpop.f32.mrb[0].mxu0  ;;  %v1891_v16 = vpop.f32.mrb[4].mxu1 }
 0x119   : > { %v440_v10 = vpop.f32.mrb[1].mxu0  ;;  %v602_v13 = vmul.f32 %v1435_v9, %v533_v61  ;;  %v1893_v20 = vpop.f32.mrb[5].mxu1 }
 0x11a   : > { %v1436_v12 = vpop.f32.mrb[2].mxu0  ;;  %v600_v18 = vmul.f32 %v523_v62, %v440_v10  ;;  %v1895_v22 = vpop.f32.mrb[6].mxu1  ;;  %v1353_v62 = vld [vmem:[%s266_s29] ss:$0 sm:$0xff]  ;;  %s1001_s29 = scalar_lea.vmem (!%p1354_p10), [#allocation2], %s1368_s25 }
 0x11b   : > { %v603_v14 = vmul.f32 %v1436_v12, %v538_v63  ;;  %v443_v15 = vpop.f32.mrb[3].mxu0  ;;  %v1897_v24 = vpop.f32.mrb[7].mxu1 }
 0x11c   : > { %v601_v19 = vmul.f32 %v528_v0, %v443_v15 }
 0x11d   : > { %v617_v21 = vpack.c.bf16 %v603_v14, %v602_v13 }
 0x11e   : > { %v616_v23 = vpack.c.bf16 %v601_v19, %v600_v18 }
 0x120   : > { %v1439_v25 = vpop.f32.mrb[4].mxu0  ;;  %1497 = vmatprep.mubr.bf16.mxu0 %v616_v23 }
 0x121   : > { %v456_v27 = vpop.f32.mrb[5].mxu0  ;;  %1498 = vmatmul.mubr.bf16.vlgmr.msra.gmra.mrb[16].mxu0 %v617_v21  ;;  %v606_v30 = vmul.f32 %v1439_v25, %v553_v28 }
 0x122   : > { %v1440_v29 = vpop.f32.mrb[6].mxu0  ;;  %v604_v33 = vmul.f32 %v543_v17, %v456_v27 }
 0x123   : > { %v607_v31 = vmul.f32 %v1440_v29, %v558_v26  ;;  %v459_v32 = vpop.f32.mrb[7].mxu0 }
 0x124   : > { %v605_v34 = vmul.f32 %v548_v11, %v459_v32 }
 0x125   : > { %v619_v35 = vpack.c.bf16 %v607_v31, %v606_v30 }
 0x126   : > { %v618_v36 = vpack.c.bf16 %v605_v34, %v604_v33 }
 0x128   : > { %v1443_v37 = vpop.f32.mrb[8].mxu0  ;;  %1501 = vmatprep.mubr.bf16.mxu0 %v618_v36 }
 0x129   : > { %v472_v38 = vpop.f32.mrb[9].mxu0  ;;  %1502 = vmatmul.mubr.bf16.gmra.mrb[20].mxu0 %v619_v35  ;;  %v610_v41 = vmul.f32 %v1443_v37, %v573_v7 }
 0x12a   : > { %v1444_v39 = vpop.f32.mrb[10].mxu0  ;;  %v608_v45 = vmul.f32 %v563_v2, %v472_v38 }
 0x12b   : > { %v611_v42 = vmul.f32 %v1444_v39, %v578_v4  ;;  %v475_v43 = vpop.f32.mrb[11].mxu0 }
 0x12c   : > { %v609_v46 = vmul.f32 %v568_v1, %v475_v43 }
 0x12d   : > { %v621_v47 = vpack.c.bf16 %v611_v42, %v610_v41 }
 0x12e   : > { %v620_v48 = vpack.c.bf16 %v609_v46, %v608_v45 }
 0x130   : > { %v1447_v49 = vpop.f32.mrb[12].mxu0  ;;  %1505 = vmatprep.mubr.bf16.mxu1 %v620_v48 }
 0x131   : > { %v488_v51 = vpop.f32.mrb[13].mxu0  ;;  %1506 = vmatmul.mubr.bf16.vlgmr.msra.gmra.mrb[8].mxu1 %v621_v47  ;;  %v614_v54 = vmul.f32 %v1447_v49, %v593_v52 }
 0x132   : > { %v1448_v53 = vpop.f32.mrb[14].mxu0  ;;  %v612_v57 = vmul.f32 %v583_v44, %v488_v51 }
 0x133   : > { %v615_v55 = vmul.f32 %v1448_v53, %v598_v50  ;;  %v491_v56 = vpop.f32.mrb[15].mxu0 }
 0x134   : > { %v613_v58 = vmul.f32 %v588_v40, %v491_v56 }
 0x135   : > { %v623_v59 = vpack.c.bf16 %v615_v55, %v614_v54 }
 0x136   : > { %v622_v60 = vpack.c.bf16 %v613_v58, %v612_v57 }
 0x138   : > { %1509 = vmatprep.mubr.bf16.mxu1 %v622_v60 }
 0x139   : > { %1510 = vmatmul.mubr.bf16.gmra.mrb[12].mxu1 %v623_v59 }
 0x1f4   : > { %v1499_v61 = vpop.f32.mrb[16].mxu0 }
 0x1f5   : > { %v892_v63 = vadd.f32 %v1499_v61, %v1883_v3  ;;  %v883_v0 = vpop.f32.mrb[17].mxu0 }
 0x1f6   : > { %v884_v1 = vadd.f32 %v883_v0, %v1885_v5  ;;  %v1500_v2 = vpop.f32.mrb[18].mxu0 }
 0x1f7   : > { %v1906_v4 = vadd.f32 %v1353_v62, %v892_v63  ;;  %v895_v7 = vadd.f32 %v1500_v2, %v1887_v6  ;;  %v886_v9 = vpop.f32.mrb[19].mxu0 }
 0x1f8   : > { %v1909_v10 = vadd.f32 %v1353_v62, %v884_v1  ;;  %v887_v11 = vadd.f32 %v886_v9, %v1889_v8 }
 0x1f9   : > { %v1912_v12 = vadd.f32 %v1353_v62, %v895_v7  ;;  %v976_v40 = vmax.f32 (!%p1354_p10), %v1906_v4, 0.0 }
 0x1fa   : > { %v1914_v13 = vadd.f32 %v1353_v62, %v887_v11  ;;  %v974_v38 = vmax.f32 (!%p1354_p10), %v1909_v10, 0.0 }
 0x1fb   : > { %v977_v41 = vmax.f32 (!%p1354_p10), %v1912_v12, 0.0 }
 0x1fc   : > { %v1503_v14 = vpop.f32.mrb[20].mxu0  ;;  %v975_v39 = vmax.f32 (!%p1354_p10), %v1914_v13, 0.0 }
 0x1fd   : > { %v908_v3 = vadd.f32 %v1503_v14, %v1891_v16  ;;  %v899_v15 = vpop.f32.mrb[21].mxu0  ;;  %v991_v47 = vpack.c.bf16 (!%p1354_p10), %v977_v41, %v976_v40 }
 0x1fe   : > { %v900_v5 = vadd.f32 %v899_v15, %v1893_v20  ;;  %v1504_v17 = vpop.f32.mrb[22].mxu0  ;;  %v990_v46 = vpack.c.bf16 (!%p1354_p10), %v975_v39, %v974_v38 }
 0x1ff   : > { %v1918_v18 = vadd.f32 %v1353_v62, %v908_v3  ;;  %v911_v6 = vadd.f32 %v1504_v17, %v1895_v22  ;;  %v902_v19 = vpop.f32.mrb[23].mxu0  ;;  %1003 = vst [vmem:[%s1001_s29 + $0x8] sm:$0xff] (!%p1354_p10), %v991_v47 }
 0x200   : > { %v1921_v21 = vadd.f32 %v1353_v62, %v900_v5  ;;  %v903_v8 = vadd.f32 %v902_v19, %v1897_v24  ;;  %1002 = vst [vmem:[%s1001_s29] sm:$0xff] (!%p1354_p10), %v990_v46 }
 0x201   : > { %v1924_v23 = vadd.f32 %v1353_v62, %v911_v6  ;;  %v980_v44 = vmax.f32 (!%p1354_p10), %v1918_v18, 0.0 }
 0x202   : > { %v1926_v25 = vadd.f32 %v1353_v62, %v903_v8  ;;  %v978_v42 = vmax.f32 (!%p1354_p10), %v1921_v21, 0.0 }
 0x203   : > { %v981_v45 = vmax.f32 (!%p1354_p10), %v1924_v23, 0.0 }
 0x204   : > { %v1507_v26 = vpop.f32.mrb[8].mxu1  ;;  %v979_v43 = vmax.f32 (!%p1354_p10), %v1926_v25, 0.0 }
 0x205   : > { %v1928_v27 = vadd.f32 %v1507_v26, %v1353_v62  ;;  %v915_v16 = vpop.f32.mrb[9].mxu1  ;;  %v993_v51 = vpack.c.bf16 (!%p1354_p10), %v981_v45, %v980_v44 }
 0x206   : > { %v1930_v28 = vadd.f32 %v1353_v62, %v915_v16  ;;  %v1508_v20 = vpop.f32.mrb[10].mxu1  ;;  %v992_v50 = vpack.c.bf16 (!%p1354_p10), %v979_v43, %v978_v42 }
 0x207   : > { %v1932_v29 = vadd.f32 %v1508_v20, %v1353_v62  ;;  %v918_v30 = vpop.f32.mrb[11].mxu1  ;;  %v984_v52 = vmax.f32 (!%p1354_p10), %v1928_v27, 0.0  ;;  %1005 = vst [vmem:[%s1001_s29 + $0x18] sm:$0xff] (!%p1354_p10), %v993_v51 }
 0x208   : > { %v1934_v22 = vadd.f32 %v1353_v62, %v918_v30  ;;  %v982_v48 = vmax.f32 (!%p1354_p10), %v1930_v28, 0.0  ;;  %1004 = vst [vmem:[%s1001_s29 + $0x10] sm:$0xff] (!%p1354_p10), %v992_v50 }
 0x209   : > { %v985_v53 = vmax.f32 (!%p1354_p10), %v1932_v29, 0.0 }
 0x20a   : > { %973 = sbr.rel (%p1354_p10) target bundleno = 535 (0x217), region = 82  ;;  %v983_v49 = vmax.f32 (!%p1354_p10), %v1934_v22, 0.0 }
 0x20b   : > { %v995_v58 = vpack.c.bf16 (!%p1354_p10), %v985_v53, %v984_v52 }
 0x20c   : > { %v1511_v31 = vpop.f32.mrb[12].mxu1  ;;  %v994_v54 = vpack.c.bf16 (!%p1354_p10), %v983_v49, %v982_v48 }
 0x20d   : > { %v1936_v32 = vadd.f32 %v1511_v31, %v1353_v62  ;;  %v931_v24 = vpop.f32.mrb[13].mxu1  ;;  %1007 = vst [vmem:[%s1001_s29 + $0x28] sm:$0xff] (!%p1354_p10), %v995_v58 }
 0x20e   : > { %v1938_v33 = vadd.f32 %v1353_v62, %v931_v24  ;;  %v1512_v34 = vpop.f32.mrb[14].mxu1  ;;  %1006 = vst [vmem:[%s1001_s29 + $0x20] sm:$0xff] (!%p1354_p10), %v994_v54 }
 0x20f   : > { %v1940_v35 = vadd.f32 %v1512_v34, %v1353_v62  ;;  %v934_v36 = vpop.f32.mrb[15].mxu1  ;;  %v988_v57 = vmax.f32 (!%p1354_p10), %v1936_v32, 0.0 }
 0x210   : > { %v1942_v37 = vadd.f32 %v1353_v62, %v934_v36  ;;  %v986_v55 = vmax.f32 (!%p1354_p10), %v1938_v33, 0.0 }
 0x211   : > { %v989_v59 = vmax.f32 %v1940_v35, 0.0 }
 0x212   : > { %v987_v56 = vmax.f32 %v1942_v37, 0.0 }
 0x213   : > { %v997_v61 = vpack.c.bf16 %v989_v59, %v988_v57 }
 0x214   : > { %v996_v60 = vpack.c.bf16 %v987_v56, %v986_v55 }
 0x215   : > { %1009 = vst [vmem:[%s1001_s29 + $0x38] sm:$0xff] %v997_v61 }
 0x216   : > { %1008 = vst [vmem:[%s1001_s29 + $0x30] sm:$0xff] %v996_v60 }
 0x217 PF: > { %p1357_p11 = scmp.ne.s32.totalorder %s1668_s21, 2 }
 0x218   : > { %v1013_v62 = vlaneseq (!%p1357_p11) }
 0x219   : > { %1012 = sbr.rel (%p1357_p11) target bundleno = 889 (0x379), region = 86 }
 0x21a   : > { %v1014_v63 = vand.u32 (!%p1357_p11), 127, %v1013_v62 }
 0x21c   : > { %vm1015_vm0 = vcmp.lt.s32.totalorder (!%p1357_p11), %v1014_v63, 16 }
 0x21d   : > { %v1016_v0 = vsel (!%p1357_p11), %vm1015_vm0, %v1909_v10, -1e+30  ;;  %v1018_v1 = vsel (!%p1357_p11), %vm1015_vm0, %v1906_v4, -1e+30  ;;  %v1017_v2 = vsel (!%p1357_p11), %vm1015_vm0, %v1914_v13, -1e+30 }
 0x21e   : > { %1032 = vmax.xlane.f32.xlu0 (!%p1357_p11), %v1016_v0  ;;  %1036 = vmax.xlane.f32.xlu1 (!%p1357_p11), %v1018_v1  ;;  %v1019_v7 = vsel (!%p1357_p11), %vm1015_vm0, %v1912_v12, -1e+30  ;;  %v1020_v9 = vsel (!%p1357_p11), %vm1015_vm0, %v1921_v21, -1e+30  ;;  %v1021_v11 = vsel (!%p1357_p11), %vm1015_vm0, %v1926_v25, -1e+30 }
 0x21f   : > { %v1022_v4 = vsel (!%p1357_p11), %vm1015_vm0, %v1918_v18, -1e+30  ;;  %v1023_v10 = vsel (!%p1357_p11), %vm1015_vm0, %v1924_v23, -1e+30  ;;  %v1024_v12 = vsel (!%p1357_p11), %vm1015_vm0, %v1930_v28, -1e+30 }
 0x220   : > { %v1025_v13 = vsel %vm1015_vm0, %v1934_v22, -1e+30  ;;  %v1026_v14 = vsel %vm1015_vm0, %v1928_v27, -1e+30  ;;  %v1027_v3 = vsel %vm1015_vm0, %v1932_v29, -1e+30 }
 0x221   : > { %v1989_v15 = vsel %vm1015_vm0, %v1938_v33, -1e+30  ;;  %v1993_v5 = vsel %vm1015_vm0, %v1942_v37, -1e+30  ;;  %v1999_v17 = vsel %vm1015_vm0, %v1936_v32, -1e+30 }
 0x222   : > { %1034 = vmax.xlane.f32.xlu0 %v1017_v2  ;;  %1038 = vmax.xlane.f32.xlu1 %v1019_v7  ;;  %v2003_v18 = vsel %vm1015_vm0, %v1940_v35, -1e+30 }
 0x226   : > { %1040 = vmax.xlane.f32.xlu0 %v1020_v9  ;;  %1042 = vmax.xlane.f32.xlu1 %v1021_v11 }
 0x22a   : > { %1044 = vmax.xlane.f32.xlu0 %v1022_v4  ;;  %1046 = vmax.xlane.f32.xlu1 %v1023_v10 }
 0x22e   : > { %1048 = vmax.xlane.f32.xlu0 %v1024_v12  ;;  %1050 = vmax.xlane.f32.xlu1 %v1025_v13 }
 0x232   : > { %1052 = vmax.xlane.f32.xlu0 %v1026_v14  ;;  %1054 = vmax.xlane.f32.xlu1 %v1027_v3 }
 0x236   : > { %1056 = vmax.xlane.f32.xlu0 %v1989_v15  ;;  %1058 = vmax.xlane.f32.xlu1 %v1993_v5 }
 0x23a   : > { %1060 = vmax.xlane.f32.xlu0 %v1999_v17  ;;  %1062 = vmax.xlane.f32.xlu1 %v2003_v18 }
 0x2ab   : > { %v1033_v6 = vpop.xlane.xlu0 %1032  ;;  %v1037_v19 = vpop.xlane.xlu1 %1036 }
 0x2ac   : > { %v2007_v21 = vsub.f32 %v1016_v0, %v1033_v6  ;;  %v2009_v8 = vsub.f32 %v1018_v1, %v1037_v19 }
 0x2ae   : > { %v1080_v23 = vmul.f32 1.442695, %v2007_v21  ;;  %v1084_v25 = vmul.f32 1.442695, %v2009_v8 }
 0x2af   : > { %v1035_v26 = vpop.xlane.xlu0 %1034  ;;  %v1039_v27 = vpop.xlane.xlu1 %1038 }
 0x2b0   : > { %1588 = vpow2.f32 %v1080_v23  ;;  %v2013_v16 = vsub.f32 %v1017_v2, %v1035_v26  ;;  %v2015_v28 = vsub.f32 %v1019_v7, %v1039_v27 }
 0x2b1   : > { %1590 = vpow2.f32 %v1084_v25 }
 0x2b2   : > { %v1082_v20 = vmul.f32 1.442695, %v2013_v16  ;;  %v1086_v29 = vmul.f32 1.442695, %v2015_v28 }
 0x2b3   : > { %v1041_v30 = vpop.xlane.xlu0 %1040  ;;  %v1043_v22 = vpop.xlane.xlu1 %1042 }
 0x2b4   : > { %1592 = vpow2.f32 %v1082_v20  ;;  %v2019_v31 = vsub.f32 %v1020_v9, %v1041_v30  ;;  %v2021_v32 = vsub.f32 %v1021_v11, %v1043_v22 }
 0x2b5   : > { %1594 = vpow2.f32 %v1086_v29 }
 0x2b6   : > { %v1088_v24 = vmul.f32 1.442695, %v2019_v31  ;;  %v1090_v33 = vmul.f32 1.442695, %v2021_v32 }
 0x2b7   : > { %v1045_v34 = vpop.xlane.xlu0 %1044  ;;  %v1047_v35 = vpop.xlane.xlu1 %1046 }
 0x2b8   : > { %1596 = vpow2.f32 %v1088_v24  ;;  %v2025_v36 = vsub.f32 %v1022_v4, %v1045_v34  ;;  %v2027_v37 = vsub.f32 %v1023_v10, %v1047_v35 }
 0x2b9   : > { %1598 = vpow2.f32 %v1090_v33 }
 0x2ba   : > { %v1589_v38 = vpop.eup %1588  ;;  %v1092_v39 = vmul.f32 1.442695, %v2025_v36  ;;  %v1094_v40 = vmul.f32 1.442695, %v2027_v37 }
 0x2bb   : > { %1112 = vadd.xlane.f32.xlu0 %v1589_v38  ;;  %v1049_v41 = vpop.xlane.xlu0 %1048  ;;  %v1051_v42 = vpop.xlane.xlu1 %1050 }
 0x2bc   : > { %v1591_v43 = vpop.eup %1590  ;;  %1600 = vpow2.f32 %v1092_v39  ;;  %v2031_v44 = vsub.f32 %v1024_v12, %v1049_v41  ;;  %v2033_v45 = vsub.f32 %v1025_v13, %v1051_v42 }
 0x2bd   : > { %1602 = vpow2.f32 %v1094_v40 }
 0x2be   : > { %v1593_v46 = vpop.eup %1592  ;;  %v1096_v47 = vmul.f32 1.442695, %v2031_v44  ;;  %v1098_v48 = vmul.f32 1.442695, %v2033_v45 }
 0x2bf   : > { %1116 = vadd.xlane.f32.xlu0 %v1591_v43  ;;  %1114 = vadd.xlane.f32.xlu1 %v1593_v46  ;;  %v1053_v49 = vpop.xlane.xlu0 %1052  ;;  %v1055_v50 = vpop.xlane.xlu1 %1054 }
 0x2c0   : > { %v1595_v51 = vpop.eup %1594  ;;  %1604 = vpow2.f32 %v1096_v47  ;;  %v2037_v52 = vsub.f32 %v1026_v14, %v1053_v49  ;;  %v2039_v53 = vsub.f32 %v1027_v3, %v1055_v50 }
 0x2c1   : > { %1606 = vpow2.f32 %v1098_v48 }
 0x2c2   : > { %v1597_v54 = vpop.eup %1596  ;;  %v1100_v55 = vmul.f32 1.442695, %v2037_v52  ;;  %v1102_v56 = vmul.f32 1.442695, %v2039_v53 }
 0x2c3   : > { %1118 = vadd.xlane.f32.xlu1 %v1595_v51  ;;  %1120 = vadd.xlane.f32.xlu0 %v1597_v54  ;;  %v1057_v57 = vpop.xlane.xlu0 %1056  ;;  %v1059_v58 = vpop.xlane.xlu1 %1058 }
 0x2c4   : > { %v1599_v59 = vpop.eup %1598  ;;  %1608 = vpow2.f32 %v1100_v55  ;;  %v2044_v60 = vsub.f32 %v1989_v15, %v1057_v57  ;;  %v2047_v61 = vsub.f32 %v1993_v5, %v1059_v58 }
 0x2c5   : > { %1610 = vpow2.f32 %v1102_v56 }
 0x2c6   : > { %v1601_v62 = vpop.eup %1600  ;;  %v1104_v63 = vmul.f32 1.442695, %v2044_v60  ;;  %v1106_v0 = vmul.f32 1.442695, %v2047_v61 }
 0x2c7   : > { %1122 = vadd.xlane.f32.xlu1 %v1599_v59  ;;  %1124 = vadd.xlane.f32.xlu0 %v1601_v62  ;;  %v1061_v1 = vpop.xlane.xlu0 %1060  ;;  %v1063_v2 = vpop.xlane.xlu1 %1062 }
 0x2c8   : > { %v1603_v7 = vpop.eup %1602  ;;  %1612 = vpow2.f32 %v1104_v63  ;;  %v2052_v9 = vsub.f32 %v1999_v17, %v1061_v1  ;;  %v2055_v11 = vsub.f32 %v2003_v18, %v1063_v2 }
 0x2c9   : > { %1614 = vpow2.f32 %v1106_v0 }
 0x2ca   : > { %v1605_v4 = vpop.eup %1604  ;;  %v1108_v10 = vmul.f32 1.442695, %v2052_v9  ;;  %v1110_v12 = vmul.f32 1.442695, %v2055_v11 }
 0x2cb   : > { %1126 = vadd.xlane.f32.xlu1 %v1603_v7  ;;  %1128 = vadd.xlane.f32.xlu0 %v1605_v4  ;;  %v1607_v13 = vpop.eup %1606 }
 0x2cc   : > { %1616 = vpow2.f32 %v1108_v10 }
 0x2cd   : > { %1618 = vpow2.f32 %v1110_v12 }
 0x2ce   : > { %v1609_v14 = vpop.eup %1608 }
 0x2cf   : > { %1130 = vadd.xlane.f32.xlu1 %v1607_v13  ;;  %1132 = vadd.xlane.f32.xlu0 %v1609_v14  ;;  %v1611_v3 = vpop.eup %1610 }
 0x2d2   : > { %v1613_v15 = vpop.eup %1612 }
 0x2d3   : > { %1134 = vadd.xlane.f32.xlu1 %v1611_v3  ;;  %1136 = vadd.xlane.f32.xlu0 %v1613_v15  ;;  %v1615_v5 = vpop.eup %1614 }
 0x2d6   : > { %v1617_v17 = vpop.eup %1616 }
 0x2d7   : > { %1138 = vadd.xlane.f32.xlu1 %v1615_v5  ;;  %1140 = vadd.xlane.f32.xlu0 %v1617_v17  ;;  %v1619_v18 = vpop.eup %1618 }
 0x2db   : > { %1142 = vadd.xlane.f32.xlu1 %v1619_v18 }
 0x348   : > { %v1113_v6 = vpop.xlane.xlu0 %1112 }
 0x349   : > { %1620 = vlog2.f32 %v1113_v6 }
 0x34c   : > { %v1115_v19 = vpop.xlane.xlu1 %1114  ;;  %v1117_v23 = vpop.xlane.xlu0 %1116 }
 0x34d   : > { %1622 = vlog2.f32 %v1115_v19 }
 0x34e   : > { %1624 = vlog2.f32 %v1117_v23 }
 0x350   : > { %v1119_v25 = vpop.xlane.xlu1 %1118  ;;  %v1121_v26 = vpop.xlane.xlu0 %1120 }
 0x351   : > { %1626 = vlog2.f32 %v1119_v25 }
 0x352   : > { %1628 = vlog2.f32 %v1121_v26 }
 0x353   : > { %v1621_v27 = vpop.eup %1620 }
 0x354   : > { %v1145_v20 = vmul.f32 0.6931472, %v1621_v27  ;;  %v1123_v29 = vpop.xlane.xlu1 %1122  ;;  %v1125_v30 = vpop.xlane.xlu0 %1124 }
 0x355   : > { %1630 = vlog2.f32 %v1123_v29 }
 0x356   : > { %v1176_v22 = vsub.f32 %v2007_v21, %v1145_v20  ;;  %1632 = vlog2.f32 %v1125_v30 }
 0x357   : > { %v1623_v24 = vpop.eup %1622 }
 0x358   : > { %v1625_v33 = vpop.eup %1624  ;;  %1192 = vst [vmem:[%s2138_s6] sm:$0xff] %v1176_v22  ;;  %v1147_v34 = vmul.f32 0.6931472, %v1623_v24  ;;  %v1127_v35 = vpop.xlane.xlu1 %1126 }
 0x359   : > { %v1129_v38 = vpop.xlane.xlu0 %1128  ;;  %v1149_v39 = vmul.f32 0.6931472, %v1625_v33  ;;  %1634 = vlog2.f32 %v1127_v35 }
 0x35a   : > { %v1177_v40 = vsub.f32 %v2013_v16, %v1147_v34  ;;  %1636 = vlog2.f32 %v1129_v38 }
 0x35b   : > { %v1627_v41 = vpop.eup %1626  ;;  %v1178_v42 = vsub.f32 %v2009_v8, %v1149_v39 }
 0x35c   : > { %v1629_v43 = vpop.eup %1628  ;;  %1193 = vst [vmem:[%s2138_s6 + $0x8] sm:$0xff] %v1177_v40  ;;  %v1151_v21 = vmul.f32 0.6931472, %v1627_v41  ;;  %v1131_v46 = vpop.xlane.xlu1 %1130 }
 0x35d   : > { %v1133_v47 = vpop.xlane.xlu0 %1132  ;;  %1194 = vst [vmem:[%s2138_s6 + $0x10] sm:$0xff] %v1178_v42  ;;  %v1153_v48 = vmul.f32 0.6931472, %v1629_v43  ;;  %1638 = vlog2.f32 %v1131_v46 }
 0x35e   : > { %v1179_v16 = vsub.f32 %v2015_v28, %v1151_v21  ;;  %1640 = vlog2.f32 %v1133_v47 }
 0x35f   : > { %v1631_v49 = vpop.eup %1630  ;;  %v1180_v8 = vsub.f32 %v2019_v31, %v1153_v48 }
 0x360   : > { %v1633_v50 = vpop.eup %1632  ;;  %1195 = vst [vmem:[%s2138_s6 + $0x18] sm:$0xff] %v1179_v16  ;;  %v1155_v51 = vmul.f32 0.6931472, %v1631_v49  ;;  %v1135_v54 = vpop.xlane.xlu1 %1134 }
 0x361   : > { %v1137_v55 = vpop.xlane.xlu0 %1136  ;;  %1196 = vst [vmem:[%s2138_s6 + $0x20] sm:$0xff] %v1180_v8  ;;  %v1157_v56 = vmul.f32 0.6931472, %v1633_v50  ;;  %1642 = vlog2.f32 %v1135_v54 }
 0x362   : > { %v1181_v28 = vsub.f32 %v2021_v32, %v1155_v51  ;;  %1644 = vlog2.f32 %v1137_v55 }
 0x363   : > { %v1635_v57 = vpop.eup %1634  ;;  %v1182_v31 = vsub.f32 %v2025_v36, %v1157_v56 }
 0x364   : > { %v1637_v58 = vpop.eup %1636  ;;  %1197 = vst [vmem:[%s2138_s6 + $0x28] sm:$0xff] %v1181_v28  ;;  %v1159_v59 = vmul.f32 0.6931472, %v1635_v57  ;;  %v1139_v62 = vpop.xlane.xlu1 %1138 }
 0x365   : > { %v1141_v63 = vpop.xlane.xlu0 %1140  ;;  %1198 = vst [vmem:[%s2138_s6 + $0x30] sm:$0xff] %v1182_v31  ;;  %v1161_v0 = vmul.f32 0.6931472, %v1637_v58  ;;  %1646 = vlog2.f32 %v1139_v62 }
 0x366   : > { %v1183_v32 = vsub.f32 %v2027_v37, %v1159_v59  ;;  %1648 = vlog2.f32 %v1141_v63 }
 0x367   : > { %v1639_v1 = vpop.eup %1638  ;;  %v1184_v36 = vsub.f32 %v2031_v44, %v1161_v0 }
 0x368   : > { %v1641_v2 = vpop.eup %1640  ;;  %1199 = vst [vmem:[%s2138_s6 + $0x38] sm:$0xff] %v1183_v32  ;;  %v1163_v7 = vmul.f32 0.6931472, %v1639_v1  ;;  %v1143_v4 = vpop.xlane.xlu1 %1142 }
 0x369   : > { %1200 = vst [vmem:[%s2138_s6 + $0x40] sm:$0xff] %v1184_v36  ;;  %v1165_v10 = vmul.f32 0.6931472, %v1641_v2  ;;  %1650 = vlog2.f32 %v1143_v4 }
 0x36a   : > { %v1185_v12 = vsub.f32 %v2033_v45, %v1163_v7 }
 0x36b   : > { %v1643_v37 = vpop.eup %1642  ;;  %v1186_v13 = vsub.f32 %v2037_v52, %v1165_v10 }
 0x36c   : > { %v1645_v14 = vpop.eup %1644  ;;  %1201 = vst [vmem:[%s2138_s6 + $0x48] sm:$0xff] %v1185_v12  ;;  %v1167_v44 = vmul.f32 0.6931472, %v1643_v37 }
 0x36d   : > { %1202 = vst [vmem:[%s2138_s6 + $0x50] sm:$0xff] %v1186_v13  ;;  %v1169_v3 = vmul.f32 0.6931472, %v1645_v14 }
 0x36e   : > { %v1187_v15 = vsub.f32 %v2039_v53, %v1167_v44 }
 0x36f   : > { %v1647_v5 = vpop.eup %1646  ;;  %v1188_v17 = vsub.f32 %v2044_v60, %v1169_v3 }
 0x370   : > { %v1649_v45 = vpop.eup %1648  ;;  %1203 = vst [vmem:[%s2138_s6 + $0x58] sm:$0xff] %v1187_v15  ;;  %v1171_v52 = vmul.f32 0.6931472, %v1647_v5 }
 0x371   : > { %1204 = vst [vmem:[%s2138_s6 + $0x60] sm:$0xff] %v1188_v17  ;;  %v1173_v18 = vmul.f32 0.6931472, %v1649_v45 }
 0x372   : > { %v1189_v6 = vsub.f32 %v2047_v61, %v1171_v52 }
 0x373   : > { %v1651_v19 = vpop.eup %1650  ;;  %v1190_v23 = vsub.f32 %v2052_v9, %v1173_v18 }
 0x374   : > { %1205 = vst [vmem:[%s2138_s6 + $0x68] sm:$0xff] %v1189_v6  ;;  %v1175_v53 = vmul.f32 0.6931472, %v1651_v19 }
 0x375   : > { %1206 = vst [vmem:[%s2138_s6 + $0x70] sm:$0xff] %v1190_v23 }
 0x376   : > { %v1191_v60 = vsub.f32 %v2055_v11, %v1175_v53 }
 0x378   : > { %1207 = vst [vmem:[%s2138_s6 + $0x78] sm:$0xff] %v1191_v60 }
 0x379 PF: > { %s16_s23 = sadd.s32 1, %s1676_s23   ;;  %s2139_s21 = smov %s1672_s22 }
 0x37a   : > { %p13_p12 = scmp.ge.s32.totalorder %s16_s23, 5   ;;  %s2140_s22 = smov %s2142_s24 }
 0x37c   :  { %15 = sbr.rel (!%p13_p12) target bundleno = 2 (0x2), region = 135 }
 0x383   :  { %1230 = vsyncmov [#allocation3] }
 0x386   :  { %s1231_s13 = vpop.sfrf %1230 }
 0x387   :  { %p1362_p13 = scmp.ne.s32.totalorder %s1231_s13, 0 }
 0x389   :  { %1235 = shalt.err (%p1362_p13)  }

</bundles_post_ra>
